<compile_context>
chip_gen: v5e
topology: v5e:2x2
jax: 0.10.0
libtpu: 0.0.40
codegen_flags: <defaults>
</compile_context>

<pallas_src>
import functools
import math

import jax
import jax.numpy as jnp
from jax import lax
from jax.experimental import pallas as pl
from jax.experimental.pallas import tpu as pltpu

T = 0.2      # temperature (module default)
EPS = 1e-5   # eps (module default)


def _round_up(a: int, b: int) -> int:
    return ((a + b - 1) // b) * b


def _make_kernel(b_real: int, inv_t: float, tm: int, tk: int, nc: int):
    """Kernel closure over the true batch size, 1/temperature and the tiling."""

    def kernel(xr_ref, xc_ref, lr_ref, lc_ref,
               out_loss_ref, out_cnt_ref,
               e_ref, unsim_ref, psc_ref, cnt_ref):
        i = pl.program_id(0)   # row-tile index  ("parallel")
        j = pl.program_id(1)   # column-tile index ("arbitrary", innermost)

        @pl.when(j == 0)
        def _():
            unsim_ref[...] = jnp.zeros_like(unsim_ref)
            psc_ref[...] = jnp.zeros_like(psc_ref)
            cnt_ref[...] = jnp.zeros_like(cnt_ref)

        # (TM, TK) block of the cosine Gram matrix on the MXU: plain NN matmul
        # against the pre-transposed (Dp, TK) column block, f32 accumulation.
        cos = lax.dot_general(
            xr_ref[...], xc_ref[...], (((1,), (0,)), ((), ())),
            preferred_element_type=jnp.float32)
        scaled = cos * inv_t          # cos / t   (VPU)
        e = jnp.exp(scaled)           # EUP, f32 epilogue (v5e-safe)

        # Masks from broadcast (TM,1) x (1,TK) compares (no 2-D iota temps).
        lab_r = lr_ref[...]                                           # (TM, 1)
        lab_c = lc_ref[...]                                           # (1, TK)
        same = lab_r == lab_c                                         # (TM, TK)
        row_g = lax.broadcasted_iota(jnp.int32, (tm, 1), 0) + i * tm  # (TM, 1)
        col_g = lax.broadcasted_iota(jnp.int32, (1, tk), 1) + j * tk  # (1, TK)
        row_ok = row_g < b_real
        col_ok = col_g < b_real

        # negatives: different label & real column (diag is never a negative).
        neg = jnp.logical_and(jnp.logical_not(same), col_ok)
        unsim_ref[...] += jnp.sum(jnp.where(neg, e, 0.0),
                                  axis=-1, keepdims=True)

        # positives: same label, off-diagonal, in-bounds row and column.
        # (pad label is -1, but row_ok/col_ok gate both masks, so a legitimate
        #  user label of -1 stays safe.)
        pos = same & (row_g != col_g) & row_ok & col_ok

        # Stash exp(cos/t) of the positives for the deferred log pass; the rest
        # of what the loss needs is accumulated incrementally right here.
        e_ref[j] = jnp.where(pos, e, 0.0)
        psc_ref[...] += jnp.sum(jnp.where(pos, scaled, 0.0),
                                axis=-1, keepdims=True)
        cnt_ref[...] += jnp.sum(jnp.where(pos, 1.0, 0.0),
                                axis=-1, keepdims=True)

        # Last column step: unsim is complete -> one log pass over the stash.
        #   -log(e/(e+unsim)) == log(e + unsim) - cos/t
        @pl.when(j == nc - 1)
        def _():
            unsim = unsim_ref[...]                                    # (TM, 1)
            acc = jnp.float32(0.0)
            for jj in range(nc):                                      # static unroll
                blk = e_ref[jj]                                       # (TM, TK)
                msk = blk > 0.0                                       # positives only
                acc = acc + jnp.sum(jnp.where(msk, jnp.log(blk + unsim), 0.0))
            partial = acc - jnp.sum(psc_ref[...])
            cnt = jnp.sum(cnt_ref[...])
            # Lane-dense (8,128) unmasked stores; wrapper reads element [0, 0].
            out_loss_ref[...] = jnp.full(out_loss_ref.shape, partial,
                                         dtype=out_loss_ref.dtype)
            out_cnt_ref[...] = jnp.full(out_cnt_ref.shape, cnt,
                                        dtype=out_cnt_ref.dtype)

    return kernel


@functools.partial(jax.jit,
                   static_argnames=("t", "eps", "use_bf16_matmul", "tm", "tk"))
def contrastive_loss(x, label, *, t=T, eps=EPS, use_bf16_matmul=True,
                     tm=128, tk=512):
    """x: (B, D) float features, label: (B,) int labels. Returns scalar loss.

    tm=128 is safe for v7x's 64 MiB/TC VMEM; on v6e (128 MiB) tm can be raised
    to 512 to cut the column re-stream traffic and per-step overhead.
    """
    B, D = x.shape
    x = x.astype(jnp.float32)

    # L2-normalize with the F.cosine_similarity eps clamp (rsqrt: no sqrt+div).
    sq = jnp.sum(x * x, axis=-1, keepdims=True)
    xn = x * lax.rsqrt(jnp.maximum(sq, eps * eps))

    # Tiling: rows in TM blocks, columns in TK blocks; pad B so both divide.
    Dp = _round_up(D, 128)
    if B <= 128:
        TM = _round_up(max(B, 8), 8)
        Bp = TM
        TK = Bp                      # single column block == full padded width
    else:
        TM = _round_up(min(tm, _round_up(B, 128)), 128)
        TK = _round_up(min(tk, _round_up(B, 128)), 128)
        Bp = _round_up(B, (TM * TK) // math.gcd(TM, TK))
    NR = Bp // TM
    NC = Bp // TK

    mm_dtype = jnp.bfloat16 if use_bf16_matmul else jnp.float32
    itemsize = jnp.dtype(mm_dtype).itemsize
    xn_p = jnp.pad(xn, ((0, Bp - B), (0, Dp - D))).astype(mm_dtype)   # (Bp, Dp)
    xn_t = xn_p.T                                                     # (Dp, Bp)

    lab = label.astype(jnp.int32)
    lab_p = jnp.pad(lab, (0, Bp - B), constant_values=-1)
    lab_row = lab_p.reshape(Bp, 1)
    lab_col = lab_p.reshape(1, Bp)

    kernel = _make_kernel(B, 1.0 / t, TM, TK, NC)

    # VMEM budget (double-buffered streamed blocks + stash + headroom) and an
    # explicit scoped-VMEM limit so the intended tiling compiles on every gen.
    vmem_bytes = (2 * TM * Dp * itemsize          # LHS row block (x2 buffers)
                  + 2 * Dp * TK * itemsize        # streamed RHS column block
                  + 2 * (TM + TK) * 4             # label blocks
                  + NC * TM * TK * 4              # positive exp(cos/t) stash
                  + 3 * TM * 4                    # row-wise accumulators
                  + 4 * 8 * 128 * 4               # outputs
                  + 8 * TM * TK * 4)              # epilogue temporaries headroom
    vmem_limit = int(min(100 * 2 ** 20, max(32 * 2 ** 20, 2 * vmem_bytes)))

    cost = pl.CostEstimate(
        flops=2 * Bp * Bp * Dp,
        transcendentals=2 * Bp * Bp,
        bytes_accessed=(NR + 1) * Bp * Dp * itemsize + 2 * Bp * 4
                       + 2 * NR * 8 * 128 * 4)

    out_loss, out_cnt = pl.pallas_call(
        kernel,
        out_shape=(jax.ShapeDtypeStruct((NR * 8, 128), jnp.float32),
                   jax.ShapeDtypeStruct((NR * 8, 128), jnp.float32)),
        grid=(NR, NC),
        in_specs=[
            pl.BlockSpec((TM, Dp), lambda i, j: (i, 0)),   # row block of xn
            pl.BlockSpec((Dp, TK), lambda i, j: (0, j)),   # streamed xn^T col blk
            pl.BlockSpec((TM, 1), lambda i, j: (i, 0)),    # labels (row layout)
            pl.BlockSpec((1, TK), lambda i, j: (0, j)),    # labels (column block)
        ],
        out_specs=[
            pl.BlockSpec((8, 128), lambda i, j: (i, 0)),
            pl.BlockSpec((8, 128), lambda i, j: (i, 0)),
        ],
        scratch_shapes=[
            pltpu.VMEM((NC, TM, TK), jnp.float32),   # positive exp(cos/t) stash
            pltpu.VMEM((TM, 1), jnp.float32),        # unsim accumulator
            pltpu.VMEM((TM, 1), jnp.float32),        # sum of cos/t over positives
            pltpu.VMEM((TM, 1), jnp.float32),        # positive-pair count
        ],
        compiler_params=pltpu.CompilerParams(
            dimension_semantics=("parallel", "arbitrary"),
            vmem_limit_bytes=vmem_limit),
        cost_estimate=cost,
    )(xn_p, xn_t, lab_row, lab_col)

    total = jnp.sum(out_loss[::8, 0])
    count = jnp.sum(out_cnt[::8, 0])
    # count == 0 (no same-label off-diagonal pair) -> inf/nan, matching PyTorch.
    return total / count


def contrastive_loss_ref(x, label, *, t=T, eps=EPS):
    """Plain-JAX reference mirroring the PyTorch forward (target=None branch)."""
    B, _ = x.shape
    x = x.astype(jnp.float32)
    sq = jnp.sum(x * x, axis=-1, keepdims=True)
    norm = jnp.maximum(jnp.sqrt(sq), eps)
    xn = x / norm
    cos = xn @ xn.T
    same = (label[:, None] == label[None, :]).astype(jnp.float32)
    eye = jnp.eye(B, dtype=jnp.float32)
    e = jnp.exp(cos / t) * (1.0 - eye)
    sim = same * e
    unsim = jnp.sum(e - sim, axis=-1, keepdims=True)
    ratio = sim / (sim + unsim)
    ratio = jnp.where(ratio <= 0.0, 1.0, ratio)
    total = jnp.sum(-jnp.log(ratio))
    count = jnp.sum(same * (1.0 - eye))
    return total / count


if __name__ == "__main__":
    key = jax.random.PRNGKey(0)
    kx, kl = jax.random.split(key)

    # Small single-tile case (B=8, D=32), 3 classes -> same-label pairs exist.
    B, D = 8, 32
    x = jax.random.normal(kx, (B, D), dtype=jnp.float32)
    label = jax.random.randint(kl, (B,), 0, 3, dtype=jnp.int32)

    ref = jax.block_until_ready(contrastive_loss_ref(x, label))

    # f32-MXU path: tight tolerance.
    loss_f32 = jax.block_until_ready(
        contrastive_loss(x, label, use_bf16_matmul=False))
    assert jnp.isfinite(loss_f32), "non-finite loss (f32 path)"
    assert jnp.allclose(loss_f32, ref, rtol=1e-4, atol=1e-4), (loss_f32, ref)

    # bf16-MXU path (default, fast on v6e/v7x): looser tolerance, since
    # exp(cos/0.2) amplifies bf16 rounding of the operands.
    loss_bf16 = jax.block_until_ready(contrastive_loss(x, label))
    assert jnp.isfinite(loss_bf16), "non-finite loss (bf16 path)"
    assert jnp.allclose(loss_bf16, ref, rtol=5e-2, atol=5e-2), (loss_bf16, ref)

    # Multi-tile case exercising the streaming / accumulator path (NR>1, NC>1).
    kx2, kl2 = jax.random.split(jax.random.PRNGKey(0), 2)
    B2, D2 = 300, 96
    x2 = jax.random.normal(kx2, (B2, D2), dtype=jnp.float32)
    label2 = jax.random.randint(kl2, (B2,), 0, 7, dtype=jnp.int32)
    ref2 = jax.block_until_ready(contrastive_loss_ref(x2, label2))
    loss2 = jax.block_until_ready(
        contrastive_loss(x2, label2, use_bf16_matmul=False, tm=128, tk=128))
    assert jnp.isfinite(loss2), "non-finite loss (multi-tile f32 path)"
    assert jnp.allclose(loss2, ref2, rtol=1e-3, atol=1e-3), (loss2, ref2)

    print("KERNEL_OK")
</pallas_src>

<mosaic_0001>
module attributes {stable_mosaic.version = 11 : i64} {
  func.func @kernel(%arg0: i32, %arg1: i32, %arg2: memref<8x128xf32, #tpu.memory_space<vmem>>, %arg3: memref<128x8xf32, #tpu.memory_space<vmem>>, %arg4: memref<8x1xi32, #tpu.memory_space<vmem>>, %arg5: memref<1x8xi32, #tpu.memory_space<vmem>>, %arg6: memref<8x128xf32, #tpu.memory_space<vmem>>, %arg7: memref<8x128xf32, #tpu.memory_space<vmem>>, %arg8: memref<1x8x8xf32, #tpu.memory_space<vmem>>, %arg9: memref<8x1xf32, #tpu.memory_space<vmem>>, %arg10: memref<8x1xf32, #tpu.memory_space<vmem>>, %arg11: memref<8x1xf32, #tpu.memory_space<vmem>>) attributes {dimension_semantics = [#tpu.dimension_semantics<parallel>, #tpu.dimension_semantics<arbitrary>], iteration_bounds = array<i64: 1, 1>, scalar_prefetch = 0 : i64, scratch_operands = 4 : i64, tpu.core_type = #tpu.core_type<tc>, window_params = [{transform_indices = @transform_0, window_bounds = array<i64: 8, 128>}, {transform_indices = @transform_1, window_bounds = array<i64: 128, 8>}, {transform_indices = @transform_2, window_bounds = array<i64: 8, 1>}, {transform_indices = @transform_3, window_bounds = array<i64: 1, 8>}, {transform_indices = @transform_4, window_bounds = array<i64: 8, 128>}, {transform_indices = @transform_5, window_bounds = array<i64: 8, 128>}]} {
    %c0_i32 = arith.constant 0 : i32
    %0 = arith.cmpi eq, %arg1, %c0_i32 : i32
    %1 = arith.extui %0 : i1 to i32
    %c0_i32_0 = arith.constant 0 : i32
    %2 = arith.cmpi ne, %1, %c0_i32_0 : i32
    scf.if %2 {
      %cst_37 = arith.constant 0.000000e+00 : f32
      %68 = vector.broadcast %cst_37 : f32 to vector<8x1xf32>
      %c0_38 = arith.constant 0 : index
      %c0_39 = arith.constant 0 : index
      %69 = vector.load %arg9[%c0_38, %c0_39] : memref<8x1xf32, #tpu.memory_space<vmem>>, vector<8x1xf32>
      tpu.vector_store %arg9[%c0_38, %c0_39], %68 {strides = array<i32>} : memref<8x1xf32, #tpu.memory_space<vmem>>, vector<8x1xf32>,
      %cst_40 = arith.constant 0.000000e+00 : f32
      %70 = vector.broadcast %cst_40 : f32 to vector<8x1xf32>
      %c0_41 = arith.constant 0 : index
      %c0_42 = arith.constant 0 : index
      %71 = vector.load %arg10[%c0_41, %c0_42] : memref<8x1xf32, #tpu.memory_space<vmem>>, vector<8x1xf32>
      tpu.vector_store %arg10[%c0_41, %c0_42], %70 {strides = array<i32>} : memref<8x1xf32, #tpu.memory_space<vmem>>, vector<8x1xf32>,
      %cst_43 = arith.constant 0.000000e+00 : f32
      %72 = vector.broadcast %cst_43 : f32 to vector<8x1xf32>
      %c0_44 = arith.constant 0 : index
      %c0_45 = arith.constant 0 : index
      %73 = vector.load %arg11[%c0_44, %c0_45] : memref<8x1xf32, #tpu.memory_space<vmem>>, vector<8x1xf32>
      tpu.vector_store %arg11[%c0_44, %c0_45], %72 {strides = array<i32>} : memref<8x1xf32, #tpu.memory_space<vmem>>, vector<8x1xf32>,
    } else {
    }
    %c0 = arith.constant 0 : index
    %c0_1 = arith.constant 0 : index
    %3 = vector.load %arg2[%c0, %c0_1] : memref<8x128xf32, #tpu.memory_space<vmem>>, vector<8x128xf32>
    %c0_2 = arith.constant 0 : index
    %c0_3 = arith.constant 0 : index
    %4 = vector.load %arg3[%c0_2, %c0_3] : memref<128x8xf32, #tpu.memory_space<vmem>>, vector<128x8xf32>
    %cst = arith.constant dense<0.000000e+00> : vector<8x8xf32>
    %5 = tpu.matmul %3, %4, %cst {dimension_numbers = #tpu.dot_dimension_numbers<[1], [0], [0], [1], [0, 0, 1, 1], [], []>} : vector<8x128xf32>, vector<128x8xf32>, vector<8x8xf32> -> vector<8x8xf32>
    %cst_4 = arith.constant 5.000000e+00 : f32
    %6 = vector.broadcast %cst_4 : f32 to vector<8x8xf32>
    %7 = arith.mulf %5, %6 : vector<8x8xf32>
    %8 = math.exp %7 : vector<8x8xf32>
    %c0_5 = arith.constant 0 : index
    %c0_6 = arith.constant 0 : index
    %9 = vector.load %arg4[%c0_5, %c0_6] : memref<8x1xi32, #tpu.memory_space<vmem>>, vector<8x1xi32>
    %c0_7 = arith.constant 0 : index
    %c0_8 = arith.constant 0 : index
    %10 = vector.load %arg5[%c0_7, %c0_8] : memref<1x8xi32, #tpu.memory_space<vmem>>, vector<1x8xi32>
    %11 = vector.broadcast %9 : vector<8x1xi32> to vector<8x8xi32>
    %12 = vector.broadcast %10 : vector<1x8xi32> to vector<8x8xi32>
    %13 = arith.cmpi eq, %11, %12 : vector<8x8xi32>
    %14 = tpu.iota {dimensions = array<i32: 0>} : vector<8x1xi32>
    %c8_i32 = arith.constant 8 : i32
    %15 = arith.muli %arg0, %c8_i32 : i32
    %16 = vector.broadcast %15 : i32 to vector<8x1xi32>
    %17 = arith.addi %14, %16 : vector<8x1xi32>
    %18 = tpu.iota {dimensions = array<i32: 1>} : vector<1x8xi32>
    %c8_i32_9 = arith.constant 8 : i32
    %19 = arith.muli %arg1, %c8_i32_9 : i32
    %20 = vector.broadcast %19 : i32 to vector<1x8xi32>
    %21 = arith.addi %18, %20 : vector<1x8xi32>
    %c8_i32_10 = arith.constant 8 : i32
    %22 = vector.broadcast %c8_i32_10 : i32 to vector<8x1xi32>
    %23 = arith.cmpi slt, %17, %22 : vector<8x1xi32>
    %c8_i32_11 = arith.constant 8 : i32
    %24 = vector.broadcast %c8_i32_11 : i32 to vector<1x8xi32>
    %25 = arith.cmpi slt, %21, %24 : vector<1x8xi32>
    %cst_12 = arith.constant dense<true> : vector<8x8xi1>
    %26 = arith.xori %13, %cst_12 : vector<8x8xi1>
    %27 = vector.broadcast %25 : vector<1x8xi1> to vector<8x8xi1>
    %28 = arith.andi %26, %27 : vector<8x8xi1>
    %c0_13 = arith.constant 0 : index
    %c0_14 = arith.constant 0 : index
    %29 = vector.load %arg9[%c0_13, %c0_14] : memref<8x1xf32, #tpu.memory_space<vmem>>, vector<8x1xf32>
    %cst_15 = arith.constant 0.000000e+00 : f32
    %30 = vector.broadcast %cst_15 : f32 to vector<8x8xf32>
    %31 = arith.select %28, %8, %30 : vector<8x8xi1>, vector<8x8xf32>
    %cst_16 = arith.constant dense<0.000000e+00> : vector<8xf32>
    %32 = vector.multi_reduction <add>, %31, %cst_16 [1] : vector<8x8xf32> to vector<8xf32>
    %33 = vector.shape_cast %32 : vector<8xf32> to vector<8x1xf32>
    %34 = arith.addf %29, %33 : vector<8x1xf32>
    %c0_17 = arith.constant 0 : index
    %c0_18 = arith.constant 0 : index
    %35 = vector.load %arg9[%c0_17, %c0_18] : memref<8x1xf32, #tpu.memory_space<vmem>>, vector<8x1xf32>
    tpu.vector_store %arg9[%c0_17, %c0_18], %34 {strides = array<i32>} : memref<8x1xf32, #tpu.memory_space<vmem>>, vector<8x1xf32>,
    %36 = vector.broadcast %17 : vector<8x1xi32> to vector<8x8xi32>
    %37 = vector.broadcast %21 : vector<1x8xi32> to vector<8x8xi32>
    %38 = arith.cmpi ne, %36, %37 : vector<8x8xi32>
    %39 = arith.andi %13, %38 : vector<8x8xi1>
    %40 = vector.broadcast %23 : vector<8x1xi1> to vector<8x8xi1>
    %41 = arith.andi %39, %40 : vector<8x8xi1>
    %42 = vector.broadcast %25 : vector<1x8xi1> to vector<8x8xi1>
    %43 = arith.andi %41, %42 : vector<8x8xi1>
    %cst_19 = arith.constant 0.000000e+00 : f32
    %44 = vector.broadcast %cst_19 : f32 to vector<8x8xf32>
    %45 = arith.select %43, %8, %44 : vector<8x8xi1>, vector<8x8xf32>
    %46 = arith.index_cast %arg1 : i32 to index
    %c0_20 = arith.constant 0 : index
    %c0_21 = arith.constant 0 : index
    %47 = vector.load %arg8[%46, %c0_20, %c0_21] : memref<1x8x8xf32, #tpu.memory_space<vmem>>, vector<1x8x8xf32>
    %48 = vector.shape_cast %47 : vector<1x8x8xf32> to vector<8x8xf32>
    %49 = vector.shape_cast %45 : vector<8x8xf32> to vector<1x8x8xf32>
    tpu.vector_store %arg8[%46, %c0_20, %c0_21], %49 {strides = array<i32>} : memref<1x8x8xf32, #tpu.memory_space<vmem>>, vector<1x8x8xf32>,
    %c0_22 = arith.constant 0 : index
    %c0_23 = arith.constant 0 : index
    %50 = vector.load %arg10[%c0_22, %c0_23] : memref<8x1xf32, #tpu.memory_space<vmem>>, vector<8x1xf32>
    %cst_24 = arith.constant 0.000000e+00 : f32
    %51 = vector.broadcast %cst_24 : f32 to vector<8x8xf32>
    %52 = arith.select %43, %7, %51 : vector<8x8xi1>, vector<8x8xf32>
    %cst_25 = arith.constant dense<0.000000e+00> : vector<8xf32>
    %53 = vector.multi_reduction <add>, %52, %cst_25 [1] : vector<8x8xf32> to vector<8xf32>
    %54 = vector.shape_cast %53 : vector<8xf32> to vector<8x1xf32>
    %55 = arith.addf %50, %54 : vector<8x1xf32>
    %c0_26 = arith.constant 0 : index
    %c0_27 = arith.constant 0 : index
    %56 = vector.load %arg10[%c0_26, %c0_27] : memref<8x1xf32, #tpu.memory_space<vmem>>, vector<8x1xf32>
    tpu.vector_store %arg10[%c0_26, %c0_27], %55 {strides = array<i32>} : memref<8x1xf32, #tpu.memory_space<vmem>>, vector<8x1xf32>,
    %c0_28 = arith.constant 0 : index
    %c0_29 = arith.constant 0 : index
    %57 = vector.load %arg11[%c0_28, %c0_29] : memref<8x1xf32, #tpu.memory_space<vmem>>, vector<8x1xf32>
    %cst_30 = arith.constant 1.000000e+00 : f32
    %cst_31 = arith.constant 0.000000e+00 : f32
    %58 = vector.broadcast %cst_30 : f32 to vector<8x8xf32>
    %59 = vector.broadcast %cst_31 : f32 to vector<8x8xf32>
    %60 = arith.select %43, %58, %59 : vector<8x8xi1>, vector<8x8xf32>
    %cst_32 = arith.constant dense<0.000000e+00> : vector<8xf32>
    %61 = vector.multi_reduction <add>, %60, %cst_32 [1] : vector<8x8xf32> to vector<8xf32>
    %62 = vector.shape_cast %61 : vector<8xf32> to vector<8x1xf32>
    %63 = arith.addf %57, %62 : vector<8x1xf32>
    %c0_33 = arith.constant 0 : index
    %c0_34 = arith.constant 0 : index
    %64 = vector.load %arg11[%c0_33, %c0_34] : memref<8x1xf32, #tpu.memory_space<vmem>>, vector<8x1xf32>
    tpu.vector_store %arg11[%c0_33, %c0_34], %63 {strides = array<i32>} : memref<8x1xf32, #tpu.memory_space<vmem>>, vector<8x1xf32>,
    %c0_i32_35 = arith.constant 0 : i32
    %65 = arith.cmpi eq, %arg1, %c0_i32_35 : i32
    %66 = arith.extui %65 : i1 to i32
    %c0_i32_36 = arith.constant 0 : i32
    %67 = arith.cmpi ne, %66, %c0_i32_36 : i32
    scf.if %67 {
      %c0_37 = arith.constant 0 : index
      %c0_38 = arith.constant 0 : index
      %68 = vector.load %arg9[%c0_37, %c0_38] : memref<8x1xf32, #tpu.memory_space<vmem>>, vector<8x1xf32>
      %c0_39 = arith.constant 0 : index
      %c0_40 = arith.constant 0 : index
      %c0_41 = arith.constant 0 : index
      %69 = vector.load %arg8[%c0_39, %c0_40, %c0_41] : memref<1x8x8xf32, #tpu.memory_space<vmem>>, vector<1x8x8xf32>
      %70 = vector.shape_cast %69 : vector<1x8x8xf32> to vector<8x8xf32>
      %cst_42 = arith.constant 0.000000e+00 : f32
      %71 = vector.broadcast %cst_42 : f32 to vector<8x8xf32>
      %72 = arith.cmpf ogt, %70, %71 : vector<8x8xf32>
      %73 = vector.broadcast %68 : vector<8x1xf32> to vector<8x8xf32>
      %74 = arith.addf %70, %73 : vector<8x8xf32>
      %75 = math.log %74 : vector<8x8xf32>
      %cst_43 = arith.constant 0.000000e+00 : f32
      %76 = vector.broadcast %cst_43 : f32 to vector<8x8xf32>
      %77 = arith.select %72, %75, %76 : vector<8x8xi1>, vector<8x8xf32>
      %78 = vector.shape_cast %77 : vector<8x8xf32> to vector<1x8x8xf32>
      %cst_44 = arith.constant dense<0.000000e+00> : vector<1xf32>
      %79 = vector.multi_reduction <add>, %78, %cst_44 [1, 2] : vector<1x8x8xf32> to vector<1xf32>
      %80 = vector.shape_cast %79 : vector<1xf32> to vector<1x1x1xf32>
      %81 = vector.extract %80[0, 0, 0] : f32 from vector<1x1x1xf32>
      %cst_45 = arith.constant 0.000000e+00 : f32
      %82 = arith.addf %cst_45, %81 : f32
      %c0_46 = arith.constant 0 : index
      %c0_47 = arith.constant 0 : index
      %83 = vector.load %arg10[%c0_46, %c0_47] : memref<8x1xf32, #tpu.memory_space<vmem>>, vector<8x1xf32>
      %84 = vector.shape_cast %83 : vector<8x1xf32> to vector<1x8x1xf32>
      %cst_48 = arith.constant dense<0.000000e+00> : vector<1xf32>
      %85 = vector.multi_reduction <add>, %84, %cst_48 [1, 2] : vector<1x8x1xf32> to vector<1xf32>
      %86 = vector.shape_cast %85 : vector<1xf32> to vector<1x1x1xf32>
      %87 = vector.extract %86[0, 0, 0] : f32 from vector<1x1x1xf32>
      %88 = arith.subf %82, %87 : f32
      %c0_49 = arith.constant 0 : index
      %c0_50 = arith.constant 0 : index
      %89 = vector.load %arg11[%c0_49, %c0_50] : memref<8x1xf32, #tpu.memory_space<vmem>>, vector<8x1xf32>
      %90 = vector.shape_cast %89 : vector<8x1xf32> to vector<1x8x1xf32>
      %cst_51 = arith.constant dense<0.000000e+00> : vector<1xf32>
      %91 = vector.multi_reduction <add>, %90, %cst_51 [1, 2] : vector<1x8x1xf32> to vector<1xf32>
      %92 = vector.shape_cast %91 : vector<1xf32> to vector<1x1x1xf32>
      %93 = vector.extract %92[0, 0, 0] : f32 from vector<1x1x1xf32>
      %94 = vector.broadcast %88 : f32 to vector<8x128xf32>
      %c0_52 = arith.constant 0 : index
      %c0_53 = arith.constant 0 : index
      %95 = vector.load %arg6[%c0_52, %c0_53] : memref<8x128xf32, #tpu.memory_space<vmem>>, vector<8x128xf32>
      tpu.vector_store %arg6[%c0_52, %c0_53], %94 {strides = array<i32>} : memref<8x128xf32, #tpu.memory_space<vmem>>, vector<8x128xf32>,
      %96 = vector.broadcast %93 : f32 to vector<8x128xf32>
      %c0_54 = arith.constant 0 : index
      %c0_55 = arith.constant 0 : index
      %97 = vector.load %arg7[%c0_54, %c0_55] : memref<8x128xf32, #tpu.memory_space<vmem>>, vector<8x128xf32>
      tpu.vector_store %arg7[%c0_54, %c0_55], %96 {strides = array<i32>} : memref<8x128xf32, #tpu.memory_space<vmem>>, vector<8x128xf32>,
    } else {
    }
    return
  }
  func.func @transform_0(%arg0: i32, %arg1: i32) -> (i32, i32) {
    %c0_i32 = arith.constant 0 : i32
    %c0_i32_0 = arith.constant 0 : i32
    return %arg0, %c0_i32 : i32, i32
  }
  func.func @transform_1(%arg0: i32, %arg1: i32) -> (i32, i32) {
    %c0_i32 = arith.constant 0 : i32
    %c0_i32_0 = arith.constant 0 : i32
    return %c0_i32, %arg1 : i32, i32
  }
  func.func @transform_2(%arg0: i32, %arg1: i32) -> (i32, i32) {
    %c0_i32 = arith.constant 0 : i32
    %c0_i32_0 = arith.constant 0 : i32
    return %arg0, %c0_i32 : i32, i32
  }
  func.func @transform_3(%arg0: i32, %arg1: i32) -> (i32, i32) {
    %c0_i32 = arith.constant 0 : i32
    %c0_i32_0 = arith.constant 0 : i32
    return %c0_i32, %arg1 : i32, i32
  }
  func.func @transform_4(%arg0: i32, %arg1: i32) -> (i32, i32) {
    %c0_i32 = arith.constant 0 : i32
    %c0_i32_0 = arith.constant 0 : i32
    return %arg0, %c0_i32 : i32, i32
  }
  func.func @transform_5(%arg0: i32, %arg1: i32) -> (i32, i32) {
    %c0_i32 = arith.constant 0 : i32
    %c0_i32_0 = arith.constant 0 : i32
    return %arg0, %c0_i32 : i32, i32
  }
}

</mosaic_0001>

<bundles_post_ra>
// kernel: contrastive_loss.1
= control target key start
LH: loop header
LB: loop body
LE: loop exit
PB: predicated region body
PF: predicated region fallthrough
CT: control target
= control target key end

     0   :  { %v199_v2 = vmov 0   ;;  %v74_v19 = vlaneseq  ;;  %vm23_vm5 = vcmask 7168   ;;  %vm92_vm6 = vcmask 64512   ;;  %s322_s1 = inlined_call_operand.vmem [shape: f32[128,8], index: 1, kind: input, shape index: {}]   ;;  %s323_s2 = inlined_call_operand.vmem [shape: s32[8,1], index: 2, kind: input, shape index: {}]   ;;  %s324_s3 = inlined_call_operand.vmem [shape: s32[1,8], index: 3, kind: input, shape index: {}]   ;;  %s325_s0 = inlined_call_operand.vmem [shape: f32[8,128], index: 0, kind: input, shape index: {}]   ;;  %s326_s4 = inlined_call_operand.vmem [shape: f32[8,128], index: 4, kind: output, shape index: {0}]   ;;  %s327_s5 = inlined_call_operand.vmem [shape: f32[8,128], index: 5, kind: output, shape index: {1}]  }
   0x1   :  { %v43_v0 = vld [vmem:[%s322_s1 + $0x78] sm:$0xff]  ;;  %v42_v1 = vld [vmem:[%s322_s1 + $0x70] sm:$0xff]  ;;  %192 = vset.pattern.permute.xlu0 %v199_v2  ;;  %v41_v3 = vld [vmem:[%s322_s1 + $0x68] sm:$0xff]  ;;  %193 = vset.pattern.permute.xlu1 %v199_v2  ;;  %v200_v25 = vmov 0.0   ;;  %vm201_vm7 = vmmov 1  }
   0x2   :  { %44 = vmatpush.msra.mxu0 %v43_v0  ;;  %v40_v4 = vld [vmem:[%s322_s1 + $0x60] sm:$0xff]  ;;  %v39_v6 = vld [vmem:[%s322_s1 + $0x58] sm:$0xff]  ;;  %v38_v7 = vld [vmem:[%s322_s1 + $0x50] sm:$0xff]  ;;  %v75_v21 = vshrl.u32 %v74_v19, 7  ;;  %v80_v22 = vand.u32 127, %v74_v19  ;;  %24 = vst.msk [vmem:[#allocation3] sm:$0xff] %vm23_vm5, %v200_v25 }
   0x3   :  { %v67_v5 = vld [vmem:[%s323_s2] sm:$0xff]  ;;  %v37_v8 = vld [vmem:[%s322_s1 + $0x48] sm:$0xff]  ;;  %v35_v10 = vld [vmem:[%s322_s1 + $0x38] sm:$0xff]  ;;  %25 = vst.msk [vmem:[#allocation4] sm:$0xff] %vm23_vm5, %v200_v25 }
   0x4   :  { %45 = vmatpush.msra.mxu0 %v42_v1  ;;  %70 = vperm.xlu0 %192, %v67_v5   ;;  %v36_v9 = vld [vmem:[%s322_s1 + $0x40] sm:$0xff]  ;;  %v34_v11 = vld [vmem:[%s322_s1 + $0x30] sm:$0xff]  ;;  %v33_v12 = vld [vmem:[%s322_s1 + $0x28] sm:$0xff]  ;;  %vm99_vm0 = vcmp.ne.s32.totalorder %v75_v21, %v80_v22  ;;  %vm85_vm2 = vcmp.lt.s32.totalorder %v80_v22, 8  ;;  %26 = vst.msk [vmem:[#allocation5] sm:$0xff] %vm23_vm5, %v200_v25 }
   0x5   :  { %v32_v13 = vld [vmem:[%s322_s1 + $0x20] sm:$0xff]  ;;  %v31_v14 = vld [vmem:[%s322_s1 + $0x18] sm:$0xff]  ;;  %v30_v15 = vld [vmem:[%s322_s1 + $0x10] sm:$0xff] }
   0x6   :  { %46 = vmatpush.msra.mxu0 %v41_v3  ;;  %v29_v16 = vld [vmem:[%s322_s1 + $0x8] sm:$0xff]  ;;  %v28_v17 = vld [vmem:[%s322_s1] sm:$0xff] }
   0x7   :  { %v27_v18 = vld [vmem:[%s325_s0] sm:$0xff] }
   0x8   :  { %47 = vmatpush.msra.mxu0 %v40_v4  ;;  %v194_v20 = vld [vmem:[%s324_s3] ss:$0 sm:$0xff] }
   0x9   :  { %v90_v39 = vld [vmem:[#allocation3] sm:$0xff] }
   0xa   :  { %48 = vmatpush.msra.mxu0 %v39_v6  ;;  %v108_v46 = vld [vmem:[#allocation4] sm:$0xff] }
   0xb   :  { %v115_v36 = vld [vmem:[#allocation5] sm:$0xff] }
   0xc   :  { %49 = vmatpush.msra.mxu0 %v38_v7 }
   0xe   :  { %50 = vmatpush.msra.mxu0 %v37_v8 }
  0x10   :  { %51 = vmatpush.msra.mxu0 %v36_v9 }
  0x12   :  { %52 = vmatpush.msra.mxu0 %v35_v10 }
  0x14   :  { %53 = vmatpush.msra.mxu0 %v34_v11 }
  0x16   :  { %54 = vmatpush.msra.mxu0 %v33_v12 }
  0x18   :  { %55 = vmatpush.msra.mxu0 %v32_v13 }
  0x1a   :  { %56 = vmatpush.msra.mxu0 %v31_v14 }
  0x1c   :  { %57 = vmatpush.msra.mxu0 %v30_v15 }
  0x1e   :  { %58 = vmatpush.msra.mxu0 %v29_v16 }
  0x20   :  { %59 = vmatpush.msra.mxu0 %v28_v17 }
  0x21   :  { %60 = vmatmul.f32.vlgmr.msra.gmra.mxu0 %v27_v18 }
  0x76   :  { %v71_v23 = vpop.permute.xlu0 %70 }
  0x77   :  { %vm73_vm1 = vcmp.eq.s32.totalorder %v71_v23, %v194_v20 }
  0x78   :  { %vm100_vm3 = vmand %vm73_vm1, %vm99_vm0 }
  0x79   :  { %vm291_vm4 = vmand %vm100_vm3, %vm85_vm2 }
  0x7a   :  { %v116_v26 = vsel %vm291_vm4, 1.0, %v200_v25  ;;  %vm86_vm8 = vmxor %vm73_vm1, %vm201_vm7 }
  0x7b   :  { %v117_v27 = vsel %vm92_vm6, %v116_v26, 0.0  ;;  %vm89_vm9 = vmand %vm86_vm8, %vm85_vm2 }
  0x7c   :  { %118 = vadd.xlane.f32.xlu2 %v117_v27 }
  0x9e   :  { %v61_v28 = vpop.f32.mrf.mxu0 }
  0x9f   :  { %v64_v29 = vmul.f32 5.0, %v61_v28 }
  0xa1   :  { %v65_v30 = vmul.f32 1.442695, %v64_v29  ;;  %v109_v31 = vsel %vm291_vm4, %v64_v29, 0.0 }
  0xa2   :  { %v110_v43 = vsel %vm92_vm6, %v109_v31, 0.0 }
  0xa3   :  { %195 = vpow2.f32 %v65_v30 }
  0xa9   :  { %v196_v32 = vpop.eup %195 }
  0xaa   :  { %v105_v33 = vsel %vm291_vm4, %v196_v32, 0.0  ;;  %v91_v34 = vsel %vm89_vm9, %v196_v32, 0.0 }
  0xab   :  { %107 = vst.msk [vmem:[#allocation2] sm:$0xff] %vm92_vm6, %v105_v33  ;;  %v93_v35 = vsel %vm92_vm6, %v91_v34, 0.0 }
  0xac   :  { %94 = vadd.xlane.f32.xlu0 %v93_v35 }
  0xb2   :  { %v126_v45 = vld [vmem:[#allocation2] sm:$0xff] }
  0xb3   :  { %vm127_vm10 = vcmp.gt.f32.partialorder %v126_v45, 0.0 }
  0xef   :  { %v119_v37 = vpop.xlane.xlu2 %118 }
  0xf0   :  { %v120_v38 = vadd.f32 %v119_v37, %v115_v36 }
  0xf2   :  { %121 = vst.msk [vmem:[#allocation5] sm:$0xff] %vm23_vm5, %v120_v38 }
  0xf9   :  { %v160_v56 = vld [vmem:[#allocation5] sm:$0xff] }
  0xfa   :  { %v161_v57 = vsel %vm23_vm5, %v160_v56, 0.0 }
 0x11f   :  { %v95_v40 = vpop.xlane.xlu0 %94 }
 0x120   :  { %v96_v41 = vadd.f32 %v95_v40, %v90_v39 }
 0x122   :  { %98 = vst.msk [vmem:[#allocation3] sm:$0xff] %vm23_vm5, %v96_v41 }
 0x129   :  { %v125_v42 = vld [vmem:[#allocation3] sm:$0xff] }
 0x12a   :  { %130 = vperm.xlu1 %193, %v125_v42  }
 0x154   :  { %111 = vadd.xlane.f32.xlu1 %v110_v43 }
 0x19c   :  { %v131_v44 = vpop.permute.xlu1 %130 }
 0x19d   :  { %v133_v47 = vadd.f32 %v131_v44, %v126_v45 }
 0x19f   :  { %197 = vlog2.f32 %v133_v47 }
 0x1a5   :  { %v198_v50 = vpop.eup %197 }
 0x1a6   :  { %v135_v53 = vmul.f32 0.6931472, %v198_v50 }
 0x1a8   :  { %v136_v54 = vsel %vm127_vm10, %v135_v53, 0.0 }
 0x1a9   :  { %v137_v55 = vsel %vm92_vm6, %v136_v54, 0.0 }
 0x1c7   :  { %v112_v48 = vpop.xlane.xlu1 %111 }
 0x1c8   :  { %v113_v49 = vadd.f32 %v112_v48, %v108_v46 }
 0x1ca   :  { %114 = vst.msk [vmem:[#allocation4] sm:$0xff] %vm23_vm5, %v113_v49 }
 0x1d1   :  { %v148_v51 = vld [vmem:[#allocation4] sm:$0xff] }
 0x1d2   :  { %v149_v52 = vsel %vm23_vm5, %v148_v51, 0.0 }
 0x1d3   :  { %150 = vadd.xlane.f32.xlu2 %v149_v52 }
 0x1db   :  { %138 = vadd.xlane.f32.xlu2 %v137_v55 }
 0x1e3   :  { %162 = vadd.xlane.f32.xlu2 %v161_v57 }
 0x246   :  { %v151_v58 = vpop.xlane.xlu2 %150 }
 0x247   :  { %v152_v59 = vrot.slane %v151_v58, 4 }
 0x249   :  { %v153_v60 = vadd.f32 %v152_v59, %v151_v58 }
 0x24b   :  { %v154_v61 = vrot.slane %v153_v60, 2 }
 0x24d   :  { %v155_v1 = vadd.f32 %v154_v61, %v153_v60 }
 0x24e   :  { %v139_v62 = vpop.xlane.xlu2 %138 }
 0x24f   :  { %v140_v63 = vrot.slane %v139_v62, 4  ;;  %v156_v5 = vrot.slane %v155_v1, 1 }
 0x251   :  { %v141_v0 = vadd.f32 %v140_v63, %v139_v62  ;;  %v157_v10 = vadd.f32 %v156_v5, %v155_v1 }
 0x253   :  { %v142_v2 = vrot.slane %v141_v0, 2 }
 0x255   :  { %v143_v3 = vadd.f32 %v142_v2, %v141_v0 }
 0x256   :  { %v163_v4 = vpop.xlane.xlu2 %162 }
 0x257   :  { %v164_v6 = vrot.slane %v163_v4, 4  ;;  %v144_v7 = vrot.slane %v143_v3, 1 }
 0x259   :  { %v165_v8 = vadd.f32 %v164_v6, %v163_v4  ;;  %v145_v9 = vadd.f32 %v144_v7, %v143_v3 }
 0x25b   :  { %v166_v11 = vrot.slane %v165_v8, 2  ;;  %183 = vpush %v145_v9 }
 0x25c   :  { %185 = vpush %v157_v10 }
 0x25d   :  { %v167_v12 = vadd.f32 %v166_v11, %v165_v8 }
 0x25f   :  { %v168_v13 = vrot.slane %v167_v12, 1 }
 0x261   :  { %v169_v14 = vadd.f32 %v168_v13, %v167_v12 }
 0x263   :  { %187 = vpush %v169_v14 }
 0x28c   :  { %s184_s0 = spop %183 }
 0x28d   :  { %s186_s1 = spop %185 }
 0x28e   :  { %s159_s3 = ssub.f32 %s184_s0, %s186_s1 }
 0x290   :  { %v171_v15 = vstv %s159_s3 }
 0x291   :  { %172 = vst [vmem:[%s326_s4] sm:$0xff] %v171_v15 }
 0x294   :  { %s188_s7 = spop %187 }
 0x295   :  { %v173_v16 = vstv %s188_s7 }
 0x296   :  { %174 = vst [vmem:[%s327_s5] sm:$0xff] %v173_v16 }

</bundles_post_ra>
